<compile_context>
chip_gen: v6e
topology: v6e:2x2x1
jax: 0.10.0
libtpu: 0.0.40
codegen_flags: <defaults>
</compile_context>

<pallas_src>
import jax
import jax.numpy as jnp
from jax.experimental import pallas as pl
from jax.experimental.pallas import tpu as pltpu


_CHUNK = 1024                           # lane-rows per in-kernel accumulation chunk
_MAX_ROW_TILE = 8192                    # lane-rows per grid step (upper bound)
_BLOCK_BYTE_BUDGET = 20 * 1024 * 1024   # target for double-buffered input blocks
_VMEM_LIMIT = 32 * 1024 * 1024          # raises v5e's 16 MiB default; == v6e/v7x default
_MIN_ROWS = 32                          # keep at least one full (32,128) tile resident


def _round_up(x, m):
    return ((x + m - 1) // m) * m


def _num_tensorcores():
    """Best-effort TensorCores-per-chip (2 on v7x, 1 on v5e/v6e)."""
    try:
        info = pltpu.get_tpu_info()
    except Exception:
        return 1
    for name in ("num_tensorcores", "tensorcores_per_chip",
                 "num_cores_per_chip", "cores_per_chip"):
        v = getattr(info, name, None)
        if v is None:
            continue
        try:
            v = int(v)
        except Exception:
            continue
        if v >= 1:
            return min(v, 2)
    return 1


def _make_masked_l1_kernel(*, rows_valid, chunk, has_partial, has_oob):
    """Builds the kernel body; all static configuration is baked in via closure."""

    def kernel(out_ref, tgt_ref, msk_ref, acc_ref):
        p = pl.program_id(0)                        # core slice (v7x split; else size 1)
        s = pl.program_id(1)                        # streaming / reduction step
        T = out_ref.shape[0]                        # lane-rows in this block
        row0 = (p * pl.num_programs(1) + s) * T     # first global lane-row of the block

        @pl.when(s == 0)
        def _init():
            acc_ref[...] = jnp.zeros_like(acc_ref)

        def add_chunk(base, size, masked):
            o = out_ref[pl.ds(base, size), :].astype(jnp.float32)
            t = tgt_ref[pl.ds(base, size), :].astype(jnp.float32)
            m = msk_ref[pl.ds(base, size), :].astype(jnp.float32)
            err = jnp.abs(o - t) * m
            if masked:
                # Rows past the valid range hold unspecified pad data: drop them
                # from BOTH the numerator and the mask sum.  Use a select (not a
                # multiply) so NaN/Inf garbage cannot poison the reduction.
                gidx = row0 + base + jax.lax.broadcasted_iota(jnp.int32, (size, 128), 0)
                keep = gidx < rows_valid
                err = jnp.where(keep, err, 0.0)
                m = jnp.where(keep, m, 0.0)
            acc_ref[:, 0:1, :] += jnp.sum(err, axis=0, keepdims=True)[None]
            acc_ref[:, 1:2, :] += jnp.sum(m, axis=0, keepdims=True)[None]

        def accumulate(masked):
            n_chunks = T // chunk
            rem = T - n_chunks * chunk
            if n_chunks > 1:
                def body(i, carry):
                    add_chunk(pl.multiple_of(i * chunk, chunk), chunk, masked)
                    return carry
                jax.lax.fori_loop(0, n_chunks, body, 0)
            elif n_chunks == 1:
                add_chunk(0, chunk, masked)
            if rem:
                add_chunk(n_chunks * chunk, rem, masked)

        if not (has_partial or has_oob):
            accumulate(masked=False)                 # every block is fully valid
        else:
            @pl.when(row0 + T <= rows_valid)         # fully valid block: fast path
            def _full():
                accumulate(masked=False)

            if has_partial:
                @pl.when(jnp.logical_and(row0 < rows_valid, row0 + T > rows_valid))
                def _partial():                      # block straddles the valid end
                    accumulate(masked=True)
            # Blocks with row0 >= rows_valid (only possible when the step count
            # does not divide evenly across core slices) contribute nothing.

    return kernel


def masked_l1(output, target, mask, *, row_tile=None, num_slices=None):
    """Masked L1 loss matching the PyTorch MaskedL1.forward semantics."""
    N, C = output.shape
    assert target.shape == (N, C) and mask.shape == (N, C)
    assert 128 % C == 0, "feature dim must divide 128 (C=4 expected)"
    pack = 128 // C                                  # original rows per lane-row

    # dtypes: keep native floats (the f32 upcast happens on the tile in-kernel),
    # bool masks ship as int8 (1 B/elem); other integer masks go to f32 so no
    # values are silently truncated (matches torch's mask.float()).
    if not jnp.issubdtype(output.dtype, jnp.floating):
        output = output.astype(jnp.float32)
    if not jnp.issubdtype(target.dtype, jnp.floating):
        target = target.astype(jnp.float32)
    if mask.dtype == jnp.bool_:
        mask = mask.astype(jnp.int8)
    elif not (jnp.issubdtype(mask.dtype, jnp.floating) or mask.dtype == jnp.int8):
        mask = mask.astype(jnp.float32)

    # Lane-dense view: (N, C) -> (rows, 128) is a pure bitcast when N % pack == 0.
    # Only a ragged N (or a tiny input, kept >= 32 lane-rows for clean tiling)
    # takes a small zero pad; padded rows have mask == 0 and contribute nothing.
    Np = max(_round_up(N, pack), _MIN_ROWS * pack)
    if Np != N:
        pad = ((0, Np - N), (0, 0))
        output = jnp.pad(output, pad)
        target = jnp.pad(target, pad)
        mask = jnp.pad(mask, pad)
    rows = Np // pack                                # valid lane-rows (static)

    out2 = output.reshape(rows, 128)                 # row-major, zero-copy bitcast
    tgt2 = target.reshape(rows, 128)
    msk2 = mask.reshape(rows, 128)

    # Tile size: as large as fits comfortably (amortizes the per-grid-step
    # overhead, which matters most on v7x's fast HBM); bounded so the
    # double-buffered input blocks stay ~<= 20 MiB, which is legal on every
    # generation with the explicit 32 MiB scoped-VMEM limit below.
    if row_tile is None:
        per_row = 128 * (out2.dtype.itemsize + tgt2.dtype.itemsize + msk2.dtype.itemsize)
        row_tile = min(_MAX_ROW_TILE,
                       max(_CHUNK, (_BLOCK_BYTE_BUDGET // (2 * per_row)) // _CHUNK * _CHUNK))
    row_tile = int(max(1, min(row_tile, rows)))
    if row_tile < rows:
        row_tile = _round_up(row_tile, 32)           # sublane tiling for int8/bf16/f32
        if row_tile >= rows:
            row_tile = rows
    chunk = min(_CHUNK, row_tile)

    total_steps = -(-rows // row_tile)
    if num_slices is None:
        cores = _num_tensorcores()
        num_slices = cores if (cores > 1 and total_steps >= 2 * cores) else 1
    num_slices = max(1, min(int(num_slices), total_steps))
    steps_per_slice = -(-total_steps // num_slices)

    has_partial = (rows % row_tile) != 0
    has_oob = (num_slices * steps_per_slice) != total_steps
    last_block = total_steps - 1

    if has_oob:
        # A rectangular grid can overhang the stream when steps do not divide
        # across core slices: clamp the DMA to the last real block (in bounds)
        # and let the kernel skip it (its logical row0 >= rows).
        def in_map(p, s):
            return (jnp.minimum(p * steps_per_slice + s, last_block), 0)
    else:
        def in_map(p, s):
            return (p * steps_per_slice + s, 0)

    in_spec = pl.BlockSpec((row_tile, 128), in_map)
    acc_spec = pl.BlockSpec((1, 2, 128), lambda p, s: (p, 0, 0))

    kernel = _make_masked_l1_kernel(rows_valid=rows, chunk=chunk,
                                    has_partial=has_partial, has_oob=has_oob)

    acc = pl.pallas_call(
        kernel,
        out_shape=jax.ShapeDtypeStruct((num_slices, 2, 128), jnp.float32),
        grid_spec=pltpu.PrefetchScalarGridSpec(
            num_scalar_prefetch=0,
            grid=(num_slices, steps_per_slice),
            in_specs=[in_spec, in_spec, in_spec],
            out_specs=acc_spec),
        compiler_params=pltpu.CompilerParams(
            # TODO(synk): on v7x verify "parallel" really shards the slice axis
            # across both TensorCores; switch to pltpu.CORE_PARALLEL if it does not.
            dimension_semantics=("parallel", "arbitrary"),
            vmem_limit_bytes=_VMEM_LIMIT),
    )(out2, tgt2, msk2)

    # Tiny finalize (128 floats per core slice) in plain JAX.
    num = acc[:, 0, :].sum(axis=0).reshape(pack, C).sum(axis=0)   # (C,)  sum(|o-t|*mask)
    den = acc[:, 1, :].sum(axis=0).reshape(pack, C).sum(axis=0)   # (C,)  sum(mask)

    den_c = jnp.maximum(den, 1e-6)
    error = num / den_c                                           # per-feature L1
    total = (error * den_c).sum() / jnp.maximum(den.sum(), 1e-6)

    loss = {"total": total, "balanced total": error.mean()}
    if C >= 4:  # the module's named channels (only meaningful layout is C == 4)
        loss.update({"vm": error[0], "va": error[1], "p": error[2], "q": error[3]})
    return loss


def _reference(output, target, mask):
    """Pure-JAX reference mirroring the PyTorch module."""
    mask = mask.astype(jnp.float32)
    error = jnp.abs(output.astype(jnp.float32) - target.astype(jnp.float32))
    den = jnp.maximum(mask.sum(axis=0), 1e-6)
    error = (error * mask).sum(axis=0) / den
    total = (error * den).sum() / jnp.maximum(mask.sum(), 1e-6)
    return {"total": total, "balanced total": error.mean(),
            "vm": error[0], "va": error[1], "p": error[2], "q": error[3]}


if __name__ == "__main__":
    key = jax.random.PRNGKey(0)
    k1, k2, k3, k4, k5, k6 = jax.random.split(key, 6)

    # Shape implied by the module: batch of rows, C=4 features (vm, va, p, q).
    N, C = 64, 4
    output = jax.random.normal(k1, (N, C), dtype=jnp.float32)
    target = jax.random.normal(k2, (N, C), dtype=jnp.float32)
    mask = jax.random.uniform(k3, (N, C)) > 0.3            # boolean mask

    loss = masked_l1(output, target, mask)
    jax.block_until_ready(loss)
    ref = _reference(output, target, mask)
    for k in ref:
        assert jnp.allclose(loss[k], ref[k], atol=1e-5, rtol=1e-5), (k, loss[k], ref[k])

    # Second check: ragged batch + bf16 data + fractional f32 mask with a small
    # row-tile override exercises the in-kernel partial-block tail masking.
    N2 = 6000                                              # not a multiple of 32
    out_b = jax.random.normal(k4, (N2, C), dtype=jnp.bfloat16)
    tgt_b = jax.random.normal(k5, (N2, C), dtype=jnp.bfloat16)
    msk_b = jax.random.uniform(k6, (N2, C), dtype=jnp.float32)

    loss2 = masked_l1(out_b, tgt_b, msk_b, row_tile=96)
    jax.block_until_ready(loss2)
    ref2 = _reference(out_b, tgt_b, msk_b)
    for k in ref2:
        assert jnp.allclose(loss2[k], ref2[k], atol=1e-4, rtol=1e-4), (k, loss2[k], ref2[k])

    print("KERNEL_OK")
</pallas_src>

<mosaic_0001>
module attributes {stable_mosaic.version = 11 : i64} {
  func.func @kernel(%arg0: i32, %arg1: i32, %arg2: memref<32x128xf32, #tpu.memory_space<vmem>>, %arg3: memref<32x128xf32, #tpu.memory_space<vmem>>, %arg4: memref<32x128xi8, #tpu.memory_space<vmem>>, %arg5: memref<1x2x128xf32, #tpu.memory_space<vmem>>) attributes {dimension_semantics = [#tpu.dimension_semantics<parallel>, #tpu.dimension_semantics<arbitrary>], iteration_bounds = array<i64: 1, 1>, scalar_prefetch = 0 : i64, scratch_operands = 0 : i64, tpu.core_type = #tpu.core_type<tc>, window_params = [{transform_indices = @transform_0, window_bounds = array<i64: 32, 128>}, {transform_indices = @transform_1, window_bounds = array<i64: 32, 128>}, {transform_indices = @transform_2, window_bounds = array<i64: 32, 128>}, {transform_indices = @transform_3, window_bounds = array<i64: 1, 2, 128>}]} {
    %c0_i32 = arith.constant 0 : i32
    %0 = arith.cmpi eq, %arg1, %c0_i32 : i32
    %1 = arith.extui %0 : i1 to i32
    %c0_i32_0 = arith.constant 0 : i32
    %2 = arith.cmpi ne, %1, %c0_i32_0 : i32
    scf.if %2 {
      %cst_18 = arith.constant 0.000000e+00 : f32
      %22 = vector.broadcast %cst_18 : f32 to vector<1x2x128xf32>
      %c0_19 = arith.constant 0 : index
      %c0_20 = arith.constant 0 : index
      %c0_21 = arith.constant 0 : index
      %23 = vector.load %arg5[%c0_19, %c0_20, %c0_21] : memref<1x2x128xf32, #tpu.memory_space<vmem>>, vector<1x2x128xf32>
      tpu.vector_store %arg5[%c0_19, %c0_20, %c0_21], %22 {strides = array<i32>} : memref<1x2x128xf32, #tpu.memory_space<vmem>>, vector<1x2x128xf32>,
    } else {
    }
    %c0 = arith.constant 0 : index
    %c0_1 = arith.constant 0 : index
    %3 = vector.load %arg2[%c0, %c0_1] : memref<32x128xf32, #tpu.memory_space<vmem>>, vector<32x128xf32>
    %c0_2 = arith.constant 0 : index
    %c0_3 = arith.constant 0 : index
    %4 = vector.load %arg3[%c0_2, %c0_3] : memref<32x128xf32, #tpu.memory_space<vmem>>, vector<32x128xf32>
    %c0_4 = arith.constant 0 : index
    %c0_5 = arith.constant 0 : index
    %5 = vector.load %arg4[%c0_4, %c0_5] : memref<32x128xi8, #tpu.memory_space<vmem>>, vector<32x128xi8>
    %6 = arith.sitofp %5 : vector<32x128xi8> to vector<32x128xf32>
    %7 = arith.subf %3, %4 : vector<32x128xf32>
    %8 = math.absf %7 : vector<32x128xf32>
    %9 = arith.mulf %8, %6 : vector<32x128xf32>
    %c0_6 = arith.constant 0 : index
    %c0_7 = arith.constant 0 : index
    %c0_8 = arith.constant 0 : index
    %10 = vector.load %arg5[%c0_6, %c0_7, %c0_8] : memref<1x2x128xf32, #tpu.memory_space<vmem>>, vector<1x1x128xf32>
    %cst = arith.constant dense<0.000000e+00> : vector<128xf32>
    %11 = vector.multi_reduction <add>, %9, %cst [0] : vector<32x128xf32> to vector<128xf32>
    %12 = vector.shape_cast %11 : vector<128xf32> to vector<1x128xf32>
    %13 = vector.shape_cast %12 : vector<1x128xf32> to vector<1x1x128xf32>
    %14 = arith.addf %10, %13 : vector<1x1x128xf32>
    %c0_9 = arith.constant 0 : index
    %c0_10 = arith.constant 0 : index
    %c0_11 = arith.constant 0 : index
    %15 = vector.load %arg5[%c0_9, %c0_10, %c0_11] : memref<1x2x128xf32, #tpu.memory_space<vmem>>, vector<1x1x128xf32>
    tpu.vector_store %arg5[%c0_9, %c0_10, %c0_11], %14 {strides = array<i32>} : memref<1x2x128xf32, #tpu.memory_space<vmem>>, vector<1x1x128xf32>,
    %c0_12 = arith.constant 0 : index
    %c1 = arith.constant 1 : index
    %c0_13 = arith.constant 0 : index
    %16 = vector.load %arg5[%c0_12, %c1, %c0_13] : memref<1x2x128xf32, #tpu.memory_space<vmem>>, vector<1x1x128xf32>
    %cst_14 = arith.constant dense<0.000000e+00> : vector<128xf32>
    %17 = vector.multi_reduction <add>, %6, %cst_14 [0] : vector<32x128xf32> to vector<128xf32>
    %18 = vector.shape_cast %17 : vector<128xf32> to vector<1x128xf32>
    %19 = vector.shape_cast %18 : vector<1x128xf32> to vector<1x1x128xf32>
    %20 = arith.addf %16, %19 : vector<1x1x128xf32>
    %c0_15 = arith.constant 0 : index
    %c1_16 = arith.constant 1 : index
    %c0_17 = arith.constant 0 : index
    %21 = vector.load %arg5[%c0_15, %c1_16, %c0_17] : memref<1x2x128xf32, #tpu.memory_space<vmem>>, vector<1x1x128xf32>
    tpu.vector_store %arg5[%c0_15, %c1_16, %c0_17], %20 {strides = array<i32>} : memref<1x2x128xf32, #tpu.memory_space<vmem>>, vector<1x1x128xf32>,
    return
  }
  func.func @transform_0(%arg0: i32, %arg1: i32) -> (i32, i32) {
    %c1_i32 = arith.constant 1 : i32
    %0 = arith.muli %arg0, %c1_i32 : i32
    %1 = arith.addi %0, %arg1 : i32
    %c0_i32 = arith.constant 0 : i32
    %c0_i32_0 = arith.constant 0 : i32
    return %1, %c0_i32 : i32, i32
  }
  func.func @transform_1(%arg0: i32, %arg1: i32) -> (i32, i32) {
    %c1_i32 = arith.constant 1 : i32
    %0 = arith.muli %arg0, %c1_i32 : i32
    %1 = arith.addi %0, %arg1 : i32
    %c0_i32 = arith.constant 0 : i32
    %c0_i32_0 = arith.constant 0 : i32
    return %1, %c0_i32 : i32, i32
  }
  func.func @transform_2(%arg0: i32, %arg1: i32) -> (i32, i32) {
    %c1_i32 = arith.constant 1 : i32
    %0 = arith.muli %arg0, %c1_i32 : i32
    %1 = arith.addi %0, %arg1 : i32
    %c0_i32 = arith.constant 0 : i32
    %c0_i32_0 = arith.constant 0 : i32
    return %1, %c0_i32 : i32, i32
  }
  func.func @transform_3(%arg0: i32, %arg1: i32) -> (i32, i32, i32) {
    %c0_i32 = arith.constant 0 : i32
    %c0_i32_0 = arith.constant 0 : i32
    %c0_i32_1 = arith.constant 0 : i32
    return %arg0, %c0_i32, %c0_i32_0 : i32, i32, i32
  }
}

</mosaic_0001>

<bundles_post_ra>
// kernel: tpu_custom_call.1
= control target key start
LH: loop header
LB: loop body
LE: loop exit
PB: predicated region body
PF: predicated region fallthrough
CT: control target
= control target key end

     0   :  { %8 = vsyncpa [#allocation3], 0  ;;  %s276_s0 = inlined_call_operand.hbm [shape: f32[32,128], index: 0, kind: input, shape index: {}]   ;;  %s277_s1 = inlined_call_operand.hbm [shape: f32[32,128], index: 1, kind: input, shape index: {}]   ;;  %s278_s2 = inlined_call_operand.hbm [shape: s8[32,128], index: 2, kind: input, shape index: {}]   ;;  %s279_s3 = inlined_call_operand.hbm [shape: f32[1,2,128], index: 3, kind: output, shape index: {}]  }
   0x1   :  { %9 = vsyncpa [#allocation6], 0 }
   0x2   :  { %10 = vsyncpa [#allocation4], 0  ;;  %s237_s12 = smov [#allocation5]   ;;  %s238_s14 = smov [#allocation2]  }
   0x3   :  { %s36_s13 = sshll.u32 %s237_s12, 4  ;;  %s20_s15 = sshll.u32 %s238_s14, 4  ;;  %s37_s13 = int_to_ptr.vmem [resolvable:$true] %s36_s13  ;;  %s21_s15 = int_to_ptr.vmem [resolvable:$true] %s20_s15 }
   0x4   :  { %s159_s16 = scalar_lea.vmem %s37_s13, 512  ;;  %p164_p1 = scmp.lt.s32.totalorder %s37_s13, %s37_s13 }
   0x5   :  { %p160_p0 = scmp.ne.s32.totalorder %s37_s13, %s159_s16  ;;  %p165_p2 = scmp.lt.s32.totalorder %s159_s16, %s159_s16 }
   0x7   :  { %p166_p3 = por %p165_p2, %p164_p1 }
   0x9   :  { %p167_p4 = pnand %p166_p3, %p160_p0 }
   0xb   :  { %170 = shalt.err (!%p167_p4)
}
   0xc   :  { %s239_s17 = smov 128   ;;  %s240_s18 = smov 8  }
   0xd   :  { %42 = dma.hbm_to_vmem [thread:$0]  %s277_s1, 512, %s37_s13, [#allocation6], %s239_s17, %s239_s17, %s240_s18  }
   0xe   :  { %s179_s21 = scalar_lea.vmem %s21_s15, 512  ;;  %p184_p6 = scmp.lt.s32.totalorder %s21_s15, %s21_s15 }
   0xf   :  { %p180_p5 = scmp.ne.s32.totalorder %s21_s15, %s179_s21  ;;  %p185_p7 = scmp.lt.s32.totalorder %s179_s21, %s179_s21 }
  0x11   :  { %p186_p8 = por %p185_p7, %p184_p6 }
  0x13   :  { %p187_p9 = pnand %p186_p8, %p180_p5 }
  0x15   :  { %190 = shalt.err (!%p187_p9)
}
  0x16   :  { %26 = dma.hbm_to_vmem [thread:$0]  %s276_s0, 512, %s21_s15, [#allocation3], %s239_s17, %s239_s17, %s240_s18  }
  0x17   :  { %s241_s24 = smov [#allocation7]  }
  0x18   :  { %s52_s25 = sshll.u32 %s241_s24, 4  ;;  %s53_s25 = int_to_ptr.vmem [resolvable:$true] %s52_s25 }
  0x19   :  { %s199_s26 = scalar_lea.vmem %s53_s25, 128  ;;  %p204_p11 = scmp.lt.s32.totalorder %s53_s25, %s53_s25 }
  0x1a   :  { %p200_p10 = scmp.ne.s32.totalorder %s53_s25, %s199_s26  ;;  %p205_p12 = scmp.lt.s32.totalorder %s199_s26, %s199_s26 }
  0x1c   :  { %p206_p13 = por %p205_p12, %p204_p11 }
  0x1e   :  { %p207_p0 = pnand %p206_p13, %p200_p10 }
  0x20   :  { %210 = shalt.err (!%p207_p0)
}
  0x21   :  { %55 = dma.hbm_to_vmem [thread:$0]  %s278_s2, 128, %s53_s25, [#allocation6]  }
  0x22   :  { %231 = dma.done.wait [#allocation3], 512  }
  0x23   :  { %232 = vsyncadd [#allocation3], 4294966784 }
  0x24   :  { %233 = dma.done.wait [#allocation6], 640  }
  0x25   :  { %234 = vsyncadd [#allocation6], 4294966656  ;;  %v242_v0 = vmov 0.0   ;;  %v75_v1 = vld [vmem:[#allocation2] sm:$0xff]  ;;  %v76_v2 = vld [vmem:[#allocation2 + $0x8] sm:$0xff]  ;;  %s243_s0 = smov [#allocation8]  }
  0x26   :  { %74 = vst [vmem:[#allocation8] sm:$0x3] %v242_v0  ;;  %v77_v3 = vld [vmem:[#allocation2 + $0x10] sm:$0xff]  ;;  %v78_v4 = vld [vmem:[#allocation2 + $0x18] sm:$0xff]  ;;  %v79_v5 = vld [vmem:[#allocation5] sm:$0xff]  ;;  %s134_s2 = sshll.u32 %s243_s0, 4  ;;  %s135_s2 = int_to_ptr.vmem [resolvable:$true] %s134_s2 }
  0x27   :  { %v80_v6 = vld [vmem:[#allocation5 + $0x8] sm:$0xff]  ;;  %v81_v7 = vld [vmem:[#allocation5 + $0x10] sm:$0xff]  ;;  %v82_v8 = vld [vmem:[#allocation5 + $0x18] sm:$0xff]  ;;  %v92_v10 = vsub.f32 %v75_v1, %v79_v5  ;;  %s211_s28 = scalar_lea.vmem %s135_s2, 32  ;;  %p216_p2 = scmp.lt.s32.totalorder %s135_s2, %s135_s2 }
  0x28   :  { %v83_v9 = vld [vmem:[#allocation7] sm:$0xff]  ;;  %v93_v11 = vsub.f32 %v76_v2, %v80_v6  ;;  %v94_v16 = vsub.f32 %v77_v3, %v81_v7  ;;  %v95_v17 = vsub.f32 %v78_v4, %v82_v8  ;;  %p212_p1 = scmp.ne.s32.totalorder %s135_s2, %s211_s28  ;;  %p217_p3 = scmp.lt.s32.totalorder %s211_s28, %s211_s28 }
  0x29   :  { %v84_v12 = vunpack.c.0.s8 %v83_v9  ;;  %v85_v13 = vunpack.c.1.s8 %v83_v9  ;;  %v86_v14 = vunpack.c.2.s8 %v83_v9  ;;  %v87_v15 = vunpack.c.3.s8 %v83_v9 }
  0x2a   :  { %v96_v18 = vand.u32 2147483647, %v92_v10  ;;  %v97_v19 = vand.u32 2147483647, %v93_v11  ;;  %v98_v24 = vand.u32 2147483647, %v94_v16  ;;  %p218_p4 = por %p217_p3, %p216_p2 }
  0x2b   :  { %v88_v20 = vcvt.s32.f32 %v84_v12  ;;  %v89_v21 = vcvt.s32.f32 %v85_v13  ;;  %v90_v22 = vcvt.s32.f32 %v86_v14  ;;  %v91_v23 = vcvt.s32.f32 %v87_v15 }
  0x2c   :  { %v99_v25 = vand.u32 2147483647, %v95_v17  ;;  %p219_p5 = pnand %p218_p4, %p212_p1 }
  0x2d   :  { %v100_v26 = vmul.f32 %v96_v18, %v88_v20  ;;  %v101_v27 = vmul.f32 %v97_v19, %v89_v21  ;;  %v117_v28 = vadd.f32 %v89_v21, %v88_v20  ;;  %v102_v29 = vmul.f32 %v98_v24, %v90_v22  ;;  %v116_v45 = vld [vmem:[#allocation8 + $0x1] sm:$0x1]  ;;  %v104_v48 = vld [vmem:[#allocation8] sm:$0x1] }
  0x2e   :  { %v103_v30 = vmul.f32 %v99_v25, %v91_v23 }
  0x2f   :  { %v105_v31 = vadd.f32 %v101_v27, %v100_v26  ;;  %v118_v32 = vadd.f32 %v117_v28, %v90_v22 }
  0x31   :  { %v106_v33 = vadd.f32 %v105_v31, %v102_v29  ;;  %v119_v34 = vadd.f32 %v118_v32, %v91_v23 }
  0x33   :  { %v107_v35 = vadd.f32 %v106_v33, %v103_v30  ;;  %v120_v36 = vrot.slane %v119_v34, 4 }
  0x35   :  { %v108_v37 = vrot.slane %v107_v35, 4  ;;  %v121_v38 = vadd.f32 %v120_v36, %v119_v34 }
  0x37   :  { %v109_v39 = vadd.f32 %v108_v37, %v107_v35  ;;  %v122_v40 = vrot.slane %v121_v38, 2 }
  0x39   :  { %v110_v41 = vrot.slane %v109_v39, 2  ;;  %v123_v42 = vadd.f32 %v122_v40, %v121_v38 }
  0x3b   :  { %v111_v43 = vadd.f32 %v110_v41, %v109_v39  ;;  %v124_v44 = vrot.slane %v123_v42, 1 }
  0x3d   :  { %v112_v46 = vrot.slane %v111_v43, 1  ;;  %v125_v47 = vadd.f32 %v124_v44, %v123_v42 }
  0x3f   :  { %v113_v49 = vadd.f32 %v112_v46, %v111_v43  ;;  %v126_v50 = vadd.f32 %v125_v47, %v116_v45 }
  0x41   :  { %v114_v51 = vadd.f32 %v113_v49, %v104_v48  ;;  %127 = vst [vmem:[#allocation8 + $0x1] sm:$0x1] %v126_v50 }
  0x43   :  { %115 = vst [vmem:[#allocation8] sm:$0x1] %v114_v51 }
  0x44   :  { %222 = shalt.err (!%p219_p5)
}
  0x45   :  { %137 = dma.vmem_to_hbm [thread:$0]  %s135_s2, 32, %s279_s3, [#allocation4]  }
  0x46   :  { %235 = dma.done.wait [#allocation4], 32  }
  0x47   :  { %236 = vsyncadd [#allocation4], 4294967264 }
  0x48   :  { %141 = vsyncpa [#allocation3], 1 }
  0x49   :  { %142 = vsyncpa [#allocation6], 1 }
  0x4a   :  { %143 = vsyncpa [#allocation4], 1 }

</bundles_post_ra>
